<compile_context>
chip_gen: v7x
topology: tpu7x:2x2x1
jax: 0.10.0
libtpu: 0.0.40
codegen_flags: <defaults>
</compile_context>

<pallas_src>
import functools

import jax
import jax.numpy as jnp
from jax import lax
from jax.experimental import pallas as pl
from jax.experimental.pallas import tpu as pltpu


def _box_filter_kernel(x_ref, bh_ref, bw_ref, o_ref, *, cb, hp, wp):
    """One grid step: box-filter `cb` packed planes of shape (hp, wp)."""
    xf = x_ref[...]
    if xf.dtype != jnp.float32:
        xf = xf.astype(jnp.float32)
    bh = bh_ref[...]            # (hp, hp) bf16 band, resident across the grid
    bw = bw_ref[...]            # (wp, wp) bf16 block-diag band, resident

    f32, bf16 = jnp.float32, jnp.bfloat16

    def split_hi_lo(v):
        # Exact-enough two-term bf16 decomposition: v ~= hi + lo with
        # |v - (hi+lo)| <= 2^-18 |v|; both matmul streams then use the MXU
        # bf16 fast path while accumulating in f32.
        hi = v.astype(bf16)
        lo = (v - hi.astype(f32)).astype(bf16)
        return hi, lo

    # ---- W-pass: one flat, lane-dense matmul.  M = cb*hp, K = N = wp. ------
    x_hi, x_lo = split_hi_lo(xf.reshape(cb * hp, wp))
    t = (jnp.dot(x_hi, bw, preferred_element_type=f32)
         + jnp.dot(x_lo, bw, preferred_element_type=f32))

    # ---- H-pass: contract the row (sublane) axis with the H band. ----------
    t_hi, t_lo = split_hi_lo(t)
    if cb == 1:
        # Pure 2-D matmuls: bh pushed into the MXU once, no broadcast at all.
        o = (jnp.dot(bh, t_hi, preferred_element_type=f32)
             + jnp.dot(bh, t_lo, preferred_element_type=f32))
        o_ref[...] = o.reshape(1, hp, wp).astype(o_ref.dtype)
    else:
        t_hi = t_hi.reshape(cb, hp, wp)
        t_lo = t_lo.reshape(cb, hp, wp)
        bh_b = jnp.broadcast_to(bh, (cb, hp, hp))   # bf16: half the old bytes
        dn = (((2,), (1,)), ((0,), (0,)))
        o = (lax.dot_general(bh_b, t_hi, dn, preferred_element_type=f32)
             + lax.dot_general(bh_b, t_lo, dn, preferred_element_type=f32))
        o_ref[...] = o.astype(o_ref.dtype)


def _vmem_capacity_bytes():
    try:
        info = pltpu.get_tpu_info()
        cap = int(getattr(info, "vmem_capacity_bytes", 0) or 0)
        if cap > 0:
            return cap
    except Exception:
        pass
    return 64 * 1024 * 1024      # conservative default: fits every generation


@functools.partial(
    jax.jit,
    static_argnames=("kernel_size", "radius", "plane_chunk", "interpret"))
def box_filter_pallas(image, kernel_size=None, radius=None, *,
                      plane_chunk=None, interpret=False):
    if kernel_size is None and radius is None:
        raise ValueError("Either [kernel_size] or [radius] must be provided.")
    kernel_size = kernel_size or 2 * radius + 1
    radius = int((kernel_size - 1) / 2)

    if image.ndim != 4:
        raise ValueError("[image] must have 4 dimensions")
    B, C, H, W = image.shape
    N = B * C
    x = image.reshape(N, H, W)

    # ---- lane packing: make the last (lane) axis >= 128 wide ---------------
    g = 1 if W >= 128 else -(-128 // W)       # planes packed per lane group
    wp = g * W
    hp = -(-H // 8) * 8                       # sublane-aligned row count

    pad_planes = (-N) % g
    if hp != H or pad_planes:
        # Zero rows / zero planes are exact for an edge-clipped box sum.
        x = jnp.pad(x, ((0, pad_planes), (0, hp - H), (0, 0)))
    ng = (N + pad_planes) // g
    if g > 1:
        # packed[n, h, p*W + w] = x[n*g + p, h, w]
        x = x.reshape(ng, g, hp, W).transpose(0, 2, 1, 3).reshape(ng, hp, wp)

    # ---- band matrices (exact in bf16), built once in the wrapper ----------
    ih = jnp.arange(hp, dtype=jnp.int32)
    band_h = (jnp.abs(ih[:, None] - ih[None, :]) <= radius).astype(jnp.bfloat16)
    iw = jnp.arange(wp, dtype=jnp.int32)
    same_plane = (iw[:, None] // W) == (iw[None, :] // W)
    band_w = (same_plane
              & (jnp.abs(iw[:, None] - iw[None, :]) <= radius)
              ).astype(jnp.bfloat16)

    # ---- packed-planes per grid step (cb): generation-aware sizing ---------
    vmem_cap = _vmem_capacity_bytes()
    two_cores = vmem_cap <= 96 * 1024 * 1024            # v7x-class: 64 MiB / 2 TCs
    vmem_limit = min((vmem_cap * 3) // 4, 96 * 1024 * 1024)
    budget = (vmem_limit * 2) // 3                       # ~64 MiB v5e/v6e, ~32 MiB v7x
    fixed = 2 * 2 * (hp * hp + wp * wp)                  # double-buffered bf16 bands
    per_plane = 64 * hp * wp + 2 * hp * hp               # db'd f32 I/O + temps + bh bcast
    if plane_chunk is None:
        cb = max(1, (budget - fixed) // per_plane)
        cb = min(cb, ng)
        if two_cores and ng >= 2:
            # >= 4 grid steps (>= 2 per TensorCore) keeps both cores pipelined.
            cb = min(cb, max(1, -(-ng // 4)))
    else:
        cb = max(1, min(int(plane_chunk), ng))

    pad_blocks = (-ng) % cb
    if pad_blocks:
        x = jnp.pad(x, ((0, pad_blocks), (0, 0), (0, 0)))
    ng_total = ng + pad_blocks

    cost = pl.CostEstimate(
        flops=4 * ng_total * hp * wp * (hp + wp),
        transcendentals=0,
        bytes_accessed=(2 * ng_total * hp * wp * image.dtype.itemsize
                        + 4 * (hp * hp + wp * wp)))

    kern = functools.partial(_box_filter_kernel, cb=cb, hp=hp, wp=wp)
    out = pl.pallas_call(
        kern,
        out_shape=jax.ShapeDtypeStruct((ng_total, hp, wp), image.dtype),
        grid_spec=pltpu.PrefetchScalarGridSpec(
            num_scalar_prefetch=0,
            grid=(ng_total // cb,),
            in_specs=[
                pl.BlockSpec((cb, hp, wp), lambda i: (i, 0, 0)),
                pl.BlockSpec((hp, hp), lambda i: (0, 0)),   # resident band_h
                pl.BlockSpec((wp, wp), lambda i: (0, 0)),   # resident band_w
            ],
            out_specs=pl.BlockSpec((cb, hp, wp), lambda i: (i, 0, 0)),
        ),
        compiler_params=pltpu.CompilerParams(
            dimension_semantics=("parallel",),
            vmem_limit_bytes=vmem_limit,
        ),
        cost_estimate=cost,
        interpret=interpret,
    )(x, band_h, band_w)

    # ---- unpack / unpad -----------------------------------------------------
    out = out[:ng]
    if g > 1:
        out = (out.reshape(ng, hp, g, W).transpose(0, 2, 1, 3)
                  .reshape(ng * g, hp, W))
    out = out[:N, :H, :]
    return out.reshape(B, C, H, W)


class BoxFilter:
    """Mirrors the PyTorch BoxFilter module (no learnable parameters)."""

    def __init__(self, kernel_size=None, radius=None):
        if kernel_size is None and radius is None:
            raise ValueError("Either [kernel_size] or [radius] must be provided.")
        self.kernel_size = kernel_size or 2 * radius + 1
        self.radius = int((self.kernel_size - 1) / 2)

    def __call__(self, image):
        return box_filter_pallas(image, self.kernel_size, self.radius)


# ------------------------- pure-JAX reference (sanity check) ----------------
def _diff_x(image, r):
    left = image[:, :, r:2 * r + 1]
    middle = image[:, :, 2 * r + 1:] - image[:, :, :-2 * r - 1]
    right = image[:, :, -1:] - image[:, :, -2 * r - 1:-r - 1]
    return jnp.concatenate([left, middle, right], axis=2)


def _diff_y(image, r):
    left = image[:, :, :, r:2 * r + 1]
    middle = image[:, :, :, 2 * r + 1:] - image[:, :, :, :-2 * r - 1]
    right = image[:, :, :, -1:] - image[:, :, :, -2 * r - 1:-r - 1]
    return jnp.concatenate([left, middle, right], axis=3)


def _box_filter_ref(image, radius):
    return _diff_y(_diff_x(jnp.cumsum(image, axis=2), radius).cumsum(axis=3), radius)


if __name__ == "__main__":
    key = jax.random.PRNGKey(0)

    # Main check: module-sized input (all 8 planes pack into one 128-lane row).
    B, C, H, W = 2, 4, 16, 16
    x = jax.random.uniform(key, (B, C, H, W), dtype=jnp.float32)
    bf = BoxFilter(kernel_size=5)          # radius = 2
    out = jax.block_until_ready(bf(x))
    ref = _box_filter_ref(x, bf.radius)
    assert out.shape == (B, C, H, W)
    assert jnp.allclose(out, ref, rtol=1e-4, atol=1e-4), "mismatch vs reference"

    # Second check: H padding (20 -> 24) and the cb > 1 batched H-pass path.
    B2, C2, H2, W2 = 2, 8, 20, 16
    x2 = jax.random.uniform(jax.random.PRNGKey(1), (B2, C2, H2, W2),
                            dtype=jnp.float32)
    out2 = jax.block_until_ready(
        box_filter_pallas(x2, kernel_size=7, plane_chunk=2))
    ref2 = _box_filter_ref(x2, 3)
    assert out2.shape == (B2, C2, H2, W2)
    assert jnp.allclose(out2, ref2, rtol=1e-4, atol=1e-4), "mismatch (padded/batched)"

    print("KERNEL_OK")
</pallas_src>

<mosaic_0001>
module attributes {stable_mosaic.version = 11 : i64} {
  func.func @_box_filter_kernel(%arg0: i32, %arg1: memref<1x16x128xf32, #tpu.memory_space<vmem>>, %arg2: memref<16x16xbf16, #tpu.memory_space<vmem>>, %arg3: memref<128x128xbf16, #tpu.memory_space<vmem>>, %arg4: memref<1x16x128xf32, #tpu.memory_space<vmem>>) attributes {dimension_semantics = [#tpu.dimension_semantics<parallel>], iteration_bounds = array<i64: 1>, scalar_prefetch = 0 : i64, scratch_operands = 0 : i64, tpu.core_type = #tpu.core_type<tc>, window_params = [{transform_indices = @transform_0, window_bounds = array<i64: 1, 16, 128>}, {pipeline_mode = #tpu.pipeline_mode<synchronous>, transform_indices = @transform_1, window_bounds = array<i64: 16, 16>}, {pipeline_mode = #tpu.pipeline_mode<synchronous>, transform_indices = @transform_2, window_bounds = array<i64: 128, 128>}, {transform_indices = @transform_3, window_bounds = array<i64: 1, 16, 128>}]} {
    %c0 = arith.constant 0 : index
    %c0_0 = arith.constant 0 : index
    %c0_1 = arith.constant 0 : index
    %0 = vector.load %arg1[%c0, %c0_0, %c0_1] : memref<1x16x128xf32, #tpu.memory_space<vmem>>, vector<1x16x128xf32>
    %c0_2 = arith.constant 0 : index
    %c0_3 = arith.constant 0 : index
    %1 = vector.load %arg2[%c0_2, %c0_3] : memref<16x16xbf16, #tpu.memory_space<vmem>>, vector<16x16xbf16>
    %c0_4 = arith.constant 0 : index
    %c0_5 = arith.constant 0 : index
    %2 = vector.load %arg3[%c0_4, %c0_5] : memref<128x128xbf16, #tpu.memory_space<vmem>>, vector<128x128xbf16>
    %3 = vector.shape_cast %0 : vector<1x16x128xf32> to vector<16x128xf32>
    %4 = arith.truncf %3 : vector<16x128xf32> to vector<16x128xbf16>
    %5 = arith.extf %4 : vector<16x128xbf16> to vector<16x128xf32>
    %6 = arith.subf %3, %5 : vector<16x128xf32>
    %7 = arith.truncf %6 : vector<16x128xf32> to vector<16x128xbf16>
    %cst = arith.constant dense<0.000000e+00> : vector<16x128xf32>
    %8 = tpu.matmul %4, %2, %cst {dimension_numbers = #tpu.dot_dimension_numbers<[1], [0], [0], [1], [0, 0, 1, 1], [], []>} : vector<16x128xbf16>, vector<128x128xbf16>, vector<16x128xf32> -> vector<16x128xf32>
    %cst_6 = arith.constant dense<0.000000e+00> : vector<16x128xf32>
    %9 = tpu.matmul %7, %2, %cst_6 {dimension_numbers = #tpu.dot_dimension_numbers<[1], [0], [0], [1], [0, 0, 1, 1], [], []>} : vector<16x128xbf16>, vector<128x128xbf16>, vector<16x128xf32> -> vector<16x128xf32>
    %10 = arith.addf %8, %9 : vector<16x128xf32>
    %11 = arith.truncf %10 : vector<16x128xf32> to vector<16x128xbf16>
    %12 = arith.extf %11 : vector<16x128xbf16> to vector<16x128xf32>
    %13 = arith.subf %10, %12 : vector<16x128xf32>
    %14 = arith.truncf %13 : vector<16x128xf32> to vector<16x128xbf16>
    %cst_7 = arith.constant dense<0.000000e+00> : vector<16x128xf32>
    %15 = tpu.matmul %1, %11, %cst_7 {dimension_numbers = #tpu.dot_dimension_numbers<[1], [0], [0], [1], [0, 0, 1, 1], [], []>} : vector<16x16xbf16>, vector<16x128xbf16>, vector<16x128xf32> -> vector<16x128xf32>
    %cst_8 = arith.constant dense<0.000000e+00> : vector<16x128xf32>
    %16 = tpu.matmul %1, %14, %cst_8 {dimension_numbers = #tpu.dot_dimension_numbers<[1], [0], [0], [1], [0, 0, 1, 1], [], []>} : vector<16x16xbf16>, vector<16x128xbf16>, vector<16x128xf32> -> vector<16x128xf32>
    %17 = arith.addf %15, %16 : vector<16x128xf32>
    %18 = vector.shape_cast %17 : vector<16x128xf32> to vector<1x16x128xf32>
    %c0_9 = arith.constant 0 : index
    %c0_10 = arith.constant 0 : index
    %c0_11 = arith.constant 0 : index
    %19 = vector.load %arg4[%c0_9, %c0_10, %c0_11] : memref<1x16x128xf32, #tpu.memory_space<vmem>>, vector<1x16x128xf32>
    tpu.vector_store %arg4[%c0_9, %c0_10, %c0_11], %18 {strides = array<i32>} : memref<1x16x128xf32, #tpu.memory_space<vmem>>, vector<1x16x128xf32>,
    return
  }
  func.func @transform_0(%arg0: i32) -> (i32, i32, i32) {
    %c0_i32 = arith.constant 0 : i32
    %c0_i32_0 = arith.constant 0 : i32
    %c0_i32_1 = arith.constant 0 : i32
    return %arg0, %c0_i32, %c0_i32_0 : i32, i32, i32
  }
  func.func @transform_1(%arg0: i32) -> (i32, i32) {
    %c0_i32 = arith.constant 0 : i32
    %c0_i32_0 = arith.constant 0 : i32
    %c0_i32_1 = arith.constant 0 : i32
    return %c0_i32, %c0_i32_0 : i32, i32
  }
  func.func @transform_2(%arg0: i32) -> (i32, i32) {
    %c0_i32 = arith.constant 0 : i32
    %c0_i32_0 = arith.constant 0 : i32
    %c0_i32_1 = arith.constant 0 : i32
    return %c0_i32, %c0_i32_0 : i32, i32
  }
  func.func @transform_3(%arg0: i32) -> (i32, i32, i32) {
    %c0_i32 = arith.constant 0 : i32
    %c0_i32_0 = arith.constant 0 : i32
    %c0_i32_1 = arith.constant 0 : i32
    return %arg0, %c0_i32, %c0_i32_0 : i32, i32, i32
  }
}

</mosaic_0001>

<bundles_post_ra>
// kernel: box_filter_pallas.1
= control target key start
LH: loop header
LB: loop body
LE: loop exit
PB: predicated region body
PF: predicated region fallthrough
CT: control target
= control target key end

     0   :  { %v374_v0 = vmov 0.0   ;;  %vm375_vm0 = vmmov 0   ;;  %vm182_vm1 = vcmask 130048   ;;  %s439_s2 = inlined_call_operand.vmem [shape: bf16[128,128], index: 2, kind: input, shape index: {}]   ;;  %s440_s0 = inlined_call_operand.vmem [shape: f32[1,16,128], index: 0, kind: input, shape index: {}]   ;;  %s441_s1 = inlined_call_operand.vmem [shape: bf16[16,16], index: 1, kind: input, shape index: {}]   ;;  %s442_s3 = inlined_call_operand.vmem [shape: f32[1,16,128], index: 3, kind: output, shape index: {}]  }
   0x1   :  { %307 = vmatprep.subr.bf16.mxu1 %v374_v0  ;;  %327 = vmatprep.subr.bf16.mxu0 %v374_v0  ;;  %v365_v1 = vld [vmem:[%s439_s2] sm:$0xff]   ;;  %v366_v2 = vld [vmem:[%s439_s2 + $0x8] sm:$0xff]   ;;  %v367_v3 = vld [vmem:[%s439_s2 + $0x10] sm:$0xff]  }
   0x2   :  { %323 = vmatprep.mubr.msk.bf16.mxu1 %vm375_vm0, %v374_v0  ;;  %343 = vmatprep.mubr.msk.bf16.mxu0 %vm375_vm0, %v374_v0  ;;  %v368_v4 = vld [vmem:[%s439_s2 + $0x18] sm:$0xff]   ;;  %v369_v5 = vld [vmem:[%s439_s2 + $0x20] sm:$0xff]   ;;  %v16_v7 = vld [vmem:[%s440_s0 + $0x8] sm:$0xff] }
   0x3   :  { %308 = vmatpush3.bf16.msra.mxu1 %v365_v1  ;;  %328 = vmatpush3.bf16.msra.mxu0 %v365_v1  ;;  %v15_v6 = vld [vmem:[%s440_s0] sm:$0xff]  ;;  %v370_v9 = vld [vmem:[%s439_s2 + $0x28] sm:$0xff]   ;;  %v371_v12 = vld [vmem:[%s439_s2 + $0x30] sm:$0xff]  }
   0x4   :  { %309 = vmatprep.subr.bf16.mxu1 %v374_v0  ;;  %329 = vmatprep.subr.bf16.mxu0 %v374_v0  ;;  %v35_v8 = vpack.c.bf16 %v16_v7, %v15_v6  ;;  %v372_v15 = vld [vmem:[%s439_s2 + $0x38] sm:$0xff]   ;;  %v373_v28 = vld [vmem:[%s441_s1] sm:$0xff]  }
   0x6   :  { %v36_v10 = vunpack.c.l.bf16 %v35_v8  ;;  %v37_v11 = vunpack.c.h.bf16 %v35_v8 }
   0x7   :  { %310 = vmatpush3.bf16.msra.mxu1 %v366_v2  ;;  %330 = vmatpush3.bf16.msra.mxu0 %v366_v2 }
   0x8   :  { %311 = vmatprep.subr.bf16.mxu1 %v374_v0  ;;  %331 = vmatprep.subr.bf16.mxu0 %v374_v0  ;;  %v38_v13 = vsub.f32 %v15_v6, %v36_v10  ;;  %v39_v14 = vsub.f32 %v16_v7, %v37_v11 }
   0xa   :  { %v40_v16 = vpack.c.bf16 %v39_v14, %v38_v13 }
   0xb   :  { %312 = vmatpush3.bf16.msra.mxu1 %v367_v3  ;;  %332 = vmatpush3.bf16.msra.mxu0 %v367_v3 }
   0xc   :  { %313 = vmatprep.subr.bf16.mxu1 %v374_v0  ;;  %333 = vmatprep.subr.bf16.mxu0 %v374_v0 }
   0xf   :  { %314 = vmatpush3.bf16.msra.mxu1 %v368_v4  ;;  %334 = vmatpush3.bf16.msra.mxu0 %v368_v4 }
  0x10   :  { %315 = vmatprep.subr.bf16.mxu1 %v374_v0  ;;  %335 = vmatprep.subr.bf16.mxu0 %v374_v0 }
  0x13   :  { %316 = vmatpush3.bf16.msra.mxu1 %v369_v5  ;;  %336 = vmatpush3.bf16.msra.mxu0 %v369_v5 }
  0x14   :  { %317 = vmatprep.subr.bf16.mxu1 %v374_v0  ;;  %337 = vmatprep.subr.bf16.mxu0 %v374_v0 }
  0x17   :  { %318 = vmatpush3.bf16.msra.mxu1 %v370_v9  ;;  %338 = vmatpush3.bf16.msra.mxu0 %v370_v9 }
  0x18   :  { %319 = vmatprep.subr.bf16.mxu1 %v374_v0  ;;  %339 = vmatprep.subr.bf16.mxu0 %v374_v0 }
  0x1b   :  { %320 = vmatpush3.bf16.msra.mxu1 %v371_v12  ;;  %340 = vmatpush3.bf16.msra.mxu0 %v371_v12 }
  0x1c   :  { %321 = vmatprep.subr.bf16.mxu1 %v374_v0  ;;  %341 = vmatprep.subr.bf16.mxu0 %v374_v0 }
  0x1f   :  { %322 = vmatpush3.bf16.msra.mxu1 %v372_v15  ;;  %342 = vmatpush3.bf16.msra.mxu0 %v372_v15 }
  0x20   :  { %353 = vmatprep.subr.bf16.mxu1 %v374_v0  ;;  %347 = vmatprep.subr.bf16.mxu0 %v374_v0 }
  0x22   :  { %324 = vmatmul.mubr.bf16.vlgmr.msra.gmra.mrb[0].mxu1 %v40_v16  ;;  %344 = vmatmul.mubr.bf16.vlgmr.msra.gmra.mrb[0].mxu0 %v35_v8 }
  0x23   :  { %349 = vmatprep.mubr.msk.bf16.mxu0 %vm375_vm0, %v374_v0  ;;  %355 = vmatprep.mubr.msk.bf16.mxu1 %vm375_vm0, %v374_v0 }
  0xf5   :  { %v123_v17 = vpop.f32.mrb[0].mxu1  ;;  %v164_v18 = vpop.f32.mrb[0].mxu0 }
  0xf6   :  { %v165_v19 = vadd.f32 %v164_v18, %v123_v17  ;;  %v325_v20 = vpop.f32.mrb[1].mxu1  ;;  %v345_v21 = vpop.f32.mrb[1].mxu0 }
  0xf7   :  { %v126_v22 = vpop.f32.mrb[2].mxu1  ;;  %v167_v23 = vpop.f32.mrb[2].mxu0 }
  0xf8   :  { %v168_v24 = vadd.f32 %v167_v23, %v126_v22  ;;  %v326_v25 = vpop.f32.mrb[3].mxu1  ;;  %v346_v26 = vpop.f32.mrb[3].mxu0 }
  0xfa   :  { %v171_v27 = vpack.c.bf16 %v168_v24, %v165_v19 }
  0xfc   :  { %v172_v29 = vunpack.c.l.bf16 %v171_v27  ;;  %v173_v30 = vunpack.c.h.bf16 %v171_v27  ;;  %354 = vmatpush3.bf16.msra.mxu1 %v171_v27 }
  0xfe   :  { %v174_v31 = vsub.f32 %v165_v19, %v172_v29  ;;  %v175_v32 = vsub.f32 %v168_v24, %v173_v30 }
  0xff   :  { %356 = vmatmul.mubr.msk.bf16.vlgmr.msra.gmra.mrb[4].mxu1 %vm182_vm1, %v373_v28 }
 0x100   :  { %v176_v33 = vpack.c.bf16 %v175_v32, %v174_v31 }
 0x102   :  { %348 = vmatpush3.bf16.msra.mxu0 %v176_v33 }
 0x105   :  { %350 = vmatmul.mubr.msk.bf16.vlgmr.msra.gmra.mrb[4].mxu0 %vm182_vm1, %v373_v28 }
 0x1d2   :  { %v261_v34 = vpop.f32.mrb[4].mxu1 }
 0x1d3   :  { %v357_v35 = vpop.f32.mrb[5].mxu1 }
 0x1d4   :  { %v264_v36 = vpop.f32.mrb[6].mxu1 }
 0x1d5   :  { %v358_v37 = vpop.f32.mrb[7].mxu1 }
 0x1d8   :  { %v220_v38 = vpop.f32.mrb[4].mxu0 }
 0x1d9   :  { %v262_v39 = vadd.f32 %v261_v34, %v220_v38  ;;  %v351_v40 = vpop.f32.mrb[5].mxu0 }
 0x1da   :  { %v223_v41 = vpop.f32.mrb[6].mxu0 }
 0x1db   :  { %268 = vst [vmem:[%s442_s3] sm:$0xff] %v262_v39  ;;  %v265_v42 = vadd.f32 %v264_v36, %v223_v41  ;;  %v352_v43 = vpop.f32.mrb[7].mxu0 }
 0x1dd   :  { %269 = vst [vmem:[%s442_s3 + $0x8] sm:$0xff] %v265_v42 }

</bundles_post_ra>
